<compile_context>
chip_gen: v5e
topology: v5e:2x2
jax: 0.10.0
libtpu: 0.0.40
codegen_flags: <defaults>
</compile_context>

<pallas_src>
import jax
import jax.numpy as jnp
from jax.experimental import pallas as pl
from jax.experimental.pallas import tpu as pltpu
from jax.scipy.linalg import solve_triangular


def sgp_kernel(xT_ref, x2g_ref, zg_ref, zsqg_ref, b_ref, sf2_ref,
               meanT_ref, varT_ref):
    """One lane-dense tile of the sparse-GP predictive forward.

    xT_ref   : (D, TN)        inputs transposed (batch on the 128-lane axis)
    x2g_ref  : (1, TN)        -gamma * ||x_n||^2   (precomputed, lane-dense)
    zg_ref   : (M, D)         2*gamma * Z
    zsqg_ref : (M, 1)         -gamma * ||z_m||^2
    b_ref    : (Opad + M, M)  fused [sf2 * W^T (row-padded) ; sf2^2 * A]
    sf2_ref  : (1, 1) SMEM    signal variance
    meanT_ref: (O, TN)        predictive mean, transposed (lane-dense store)
    varT_ref : (1, TN)        predictive variance, transposed (lane-dense store)
    """
    m_dim = zg_ref.shape[0]
    o_dim = meanT_ref.shape[0]
    split = b_ref.shape[0] - m_dim      # = Opad

    xT = xT_ref[...]                    # (D, TN)
    zg = zg_ref[...]                    # (M, D)

    # s[m, n] = -gamma * ||x_n - z_m||^2  with every scalar pre-folded.
    # The K=D contraction is done as D broadcast VPU FMAs (D is tiny/static),
    # avoiding a nearly-empty MXU pass.
    s = zsqg_ref[...] + x2g_ref[...]    # (M, TN) via broadcast
    for d in range(xT.shape[0]):
        s = s + zg[:, d:d + 1] * xT[d:d + 1, :]
    e = jnp.exp(s)                      # (M, TN) = Kxz^T / sf2   (EUP)

    # Single fused MXU matmul: rows [0:O) give mean^T, rows [split:) give
    # sf2^2 * (A @ e) = (Kxz A)^T.
    r = jnp.dot(b_ref[...], e, preferred_element_type=jnp.float32)  # (Opad+M, TN)

    meanT_ref[...] = r[:o_dim, :]
    varT_ref[...] = sf2_ref[0, 0] - jnp.sum(r[split:, :] * e,
                                            axis=0, keepdims=True)


def _sgp_precompute(Z, u, gamma, sf2, jitter):
    """Shared glue: Kzz^{-1} (via Cholesky) and Kzz^{-1} u. Plain JAX."""
    M = Z.shape[0]
    zsq = jnp.sum(Z * Z, axis=-1)
    d2 = zsq[:, None] - 2.0 * Z @ Z.T + zsq[None, :]
    Kzz = sf2 * jnp.exp(-gamma * d2) + jitter * jnp.eye(M, dtype=Z.dtype)
    L = jnp.linalg.cholesky(Kzz)
    Linv = solve_triangular(L, jnp.eye(M, dtype=Z.dtype), lower=True)
    A = Linv.T @ Linv                   # Kzz^{-1}
    A = 0.5 * (A + A.T)                 # exactly symmetric
    W = A @ u                           # Kzz^{-1} u
    return A, W


def sgp_forward(x, Z, u, log_ls, log_sf, jitter=1e-2, tile_n=256):
    """Sparse-GP predictive mean / variance via a Pallas TPU kernel."""
    N, D = x.shape
    M, O = u.shape
    assert Z.shape == (M, D)

    gamma = 0.5 * jnp.exp(-2.0 * log_ls)     # 1 / (2 ls^2)
    sf2 = jnp.exp(2.0 * log_sf)

    # --- glue: parameter-side precomputation (not the hot path) -------------
    A, W = _sgp_precompute(Z, u, gamma, sf2, jitter)

    # Fold all scalars into the operands (no per-element VPU scaling in-kernel).
    Zg = (2.0 * gamma) * Z.astype(jnp.float32)                 # (M, D)
    zsqg = (-gamma * jnp.sum(Z * Z, axis=-1))[:, None]          # (M, 1)
    xT = x.astype(jnp.float32).T                                # (D, N)
    x2g = (-gamma * jnp.sum(x * x, axis=-1))[None, :]           # (1, N)

    O_pad = ((O + 7) // 8) * 8
    B = jnp.zeros((O_pad + M, M), jnp.float32)
    B = B.at[:O, :].set(sf2 * W.T)                              # mean rows
    B = B.at[O_pad:, :].set((sf2 * sf2) * A)                    # variance rows
    sf2_arr = jnp.reshape(sf2, (1, 1)).astype(jnp.float32)

    # Pad N up to a multiple of tile_n (padded columns are sliced off below).
    Np = pl.cdiv(N, tile_n) * tile_n
    if Np != N:
        xT = jnp.pad(xT, ((0, 0), (0, Np - N)))
        x2g = jnp.pad(x2g, ((0, 0), (0, Np - N)))

    grid = (Np // tile_n,)
    meanT, varT = pl.pallas_call(
        sgp_kernel,
        out_shape=(jax.ShapeDtypeStruct((O, Np), jnp.float32),
                   jax.ShapeDtypeStruct((1, Np), jnp.float32)),
        grid=grid,
        in_specs=[
            pl.BlockSpec((D, tile_n), lambda i: (0, i)),          # x^T tile
            pl.BlockSpec((1, tile_n), lambda i: (0, i)),          # -g*||x||^2
            pl.BlockSpec((M, D), lambda i: (0, 0)),               # 2g*Z
            pl.BlockSpec((M, 1), lambda i: (0, 0)),               # -g*||z||^2
            pl.BlockSpec((O_pad + M, M), lambda i: (0, 0)),       # fused [W|A]
            pl.BlockSpec(memory_space=pltpu.MemorySpace.SMEM),    # sf2 scalar
        ],
        out_specs=(pl.BlockSpec((O, tile_n), lambda i: (0, i)),
                   pl.BlockSpec((1, tile_n), lambda i: (0, i))),
        compiler_params=pltpu.CompilerParams(
            dimension_semantics=("parallel",)),
    )(xT, x2g, Zg, zsqg, B, sf2_arr)

    mean = meanT[:, :N].T                                        # (N, O)
    var = jnp.maximum(varT[:, :N].T, 0.0)                        # (N, 1)
    return mean, var


def sgp_reference(x, Z, u, log_ls, log_sf, jitter=1e-2):
    """Pure-JAX reference (standard sparse-GP predictive equations)."""
    gamma = 0.5 * jnp.exp(-2.0 * log_ls)
    sf2 = jnp.exp(2.0 * log_sf)
    A, W = _sgp_precompute(Z, u, gamma, sf2, jitter)
    xsq = jnp.sum(x * x, -1, keepdims=True)
    zsq = jnp.sum(Z * Z, -1)[None, :]
    Kxz = sf2 * jnp.exp(-gamma * (xsq - 2.0 * x @ Z.T + zsq))
    mean = Kxz @ W
    var = sf2 - jnp.sum((Kxz @ A) * Kxz, -1, keepdims=True)
    return mean, jnp.maximum(var, 0.0)


if __name__ == "__main__":
    # shapes consistent with SGP(in_features, out_features, inducing_points, ...)
    # N=512 with tile_n=256 keeps the grid length >= 2 (both v7x TensorCores).
    N, D, M, O = 512, 4, 128, 8          # batch, in_features, inducing, out_features
    key = jax.random.PRNGKey(0)
    kx, kz, ku = jax.random.split(key, 3)

    x = jax.random.normal(kx, (N, D), jnp.float32)
    Z = jax.random.normal(kz, (M, D), jnp.float32)          # inducing points
    u = 0.1 * jax.random.normal(ku, (M, O), jnp.float32)    # inducing "mean"
    log_ls = jnp.float32(0.0)                               # kernel lengthscale = 1.0
    log_sf = jnp.float32(0.0)                               # kernel signal std ("cov")

    mean, var = sgp_forward(x, Z, u, log_ls, log_sf, tile_n=256)
    jax.block_until_ready((mean, var))

    mean_ref, var_ref = sgp_reference(x, Z, u, log_ls, log_sf)
    assert mean.shape == (N, O) and var.shape == (N, 1)
    assert jnp.allclose(mean, mean_ref, atol=2e-3, rtol=2e-3)
    assert jnp.allclose(var, var_ref, atol=2e-3, rtol=2e-3)

    print("KERNEL_OK")
</pallas_src>

<mosaic_0001>
module attributes {stable_mosaic.version = 11 : i64} {
  func.func @sgp_kernel(%arg0: i32, %arg1: memref<4x256xf32, #tpu.memory_space<vmem>>, %arg2: memref<1x256xf32, #tpu.memory_space<vmem>>, %arg3: memref<128x4xf32, #tpu.memory_space<vmem>>, %arg4: memref<128x1xf32, #tpu.memory_space<vmem>>, %arg5: memref<136x128xf32, #tpu.memory_space<vmem>>, %arg6: memref<1x1xf32, #tpu.memory_space<smem>>, %arg7: memref<8x256xf32, #tpu.memory_space<vmem>>, %arg8: memref<1x256xf32, #tpu.memory_space<vmem>>) attributes {dimension_semantics = [#tpu.dimension_semantics<parallel>], iteration_bounds = array<i64: 2>, scalar_prefetch = 0 : i64, scratch_operands = 0 : i64, tpu.core_type = #tpu.core_type<tc>, window_params = [{transform_indices = @transform_0, window_bounds = array<i64: 4, 256>}, {transform_indices = @transform_1, window_bounds = array<i64: 1, 256>}, {pipeline_mode = #tpu.pipeline_mode<synchronous>, transform_indices = @transform_2, window_bounds = array<i64: 128, 4>}, {pipeline_mode = #tpu.pipeline_mode<synchronous>, transform_indices = @transform_3, window_bounds = array<i64: 128, 1>}, {pipeline_mode = #tpu.pipeline_mode<synchronous>, transform_indices = @transform_4, window_bounds = array<i64: 136, 128>}, {transform_indices = @transform_5, window_bounds = array<i64: 1, 1>}, {transform_indices = @transform_6, window_bounds = array<i64: 8, 256>}, {transform_indices = @transform_7, window_bounds = array<i64: 1, 256>}]} {
    %c0 = arith.constant 0 : index
    %c0_0 = arith.constant 0 : index
    %0 = vector.load %arg1[%c0, %c0_0] : memref<4x256xf32, #tpu.memory_space<vmem>>, vector<4x256xf32>
    %c0_1 = arith.constant 0 : index
    %c0_2 = arith.constant 0 : index
    %1 = vector.load %arg3[%c0_1, %c0_2] : memref<128x4xf32, #tpu.memory_space<vmem>>, vector<128x4xf32>
    %c0_3 = arith.constant 0 : index
    %c0_4 = arith.constant 0 : index
    %2 = vector.load %arg4[%c0_3, %c0_4] : memref<128x1xf32, #tpu.memory_space<vmem>>, vector<128x1xf32>
    %c0_5 = arith.constant 0 : index
    %c0_6 = arith.constant 0 : index
    %3 = vector.load %arg2[%c0_5, %c0_6] : memref<1x256xf32, #tpu.memory_space<vmem>>, vector<1x256xf32>
    %4 = vector.broadcast %2 : vector<128x1xf32> to vector<128x256xf32>
    %5 = vector.broadcast %3 : vector<1x256xf32> to vector<128x256xf32>
    %6 = arith.addf %4, %5 : vector<128x256xf32>
    %7 = vector.extract_strided_slice %1 {offsets = [0, 0], sizes = [128, 1], strides = [1, 1]} : vector<128x4xf32> to vector<128x1xf32>
    %8 = vector.extract_strided_slice %0 {offsets = [0, 0], sizes = [1, 256], strides = [1, 1]} : vector<4x256xf32> to vector<1x256xf32>
    %9 = vector.broadcast %7 : vector<128x1xf32> to vector<128x256xf32>
    %10 = vector.broadcast %8 : vector<1x256xf32> to vector<128x256xf32>
    %11 = arith.mulf %9, %10 : vector<128x256xf32>
    %12 = arith.addf %6, %11 : vector<128x256xf32>
    %13 = vector.extract_strided_slice %1 {offsets = [0, 1], sizes = [128, 1], strides = [1, 1]} : vector<128x4xf32> to vector<128x1xf32>
    %14 = vector.extract_strided_slice %0 {offsets = [1, 0], sizes = [1, 256], strides = [1, 1]} : vector<4x256xf32> to vector<1x256xf32>
    %15 = vector.broadcast %13 : vector<128x1xf32> to vector<128x256xf32>
    %16 = vector.broadcast %14 : vector<1x256xf32> to vector<128x256xf32>
    %17 = arith.mulf %15, %16 : vector<128x256xf32>
    %18 = arith.addf %12, %17 : vector<128x256xf32>
    %19 = vector.extract_strided_slice %1 {offsets = [0, 2], sizes = [128, 1], strides = [1, 1]} : vector<128x4xf32> to vector<128x1xf32>
    %20 = vector.extract_strided_slice %0 {offsets = [2, 0], sizes = [1, 256], strides = [1, 1]} : vector<4x256xf32> to vector<1x256xf32>
    %21 = vector.broadcast %19 : vector<128x1xf32> to vector<128x256xf32>
    %22 = vector.broadcast %20 : vector<1x256xf32> to vector<128x256xf32>
    %23 = arith.mulf %21, %22 : vector<128x256xf32>
    %24 = arith.addf %18, %23 : vector<128x256xf32>
    %25 = vector.extract_strided_slice %1 {offsets = [0, 3], sizes = [128, 1], strides = [1, 1]} : vector<128x4xf32> to vector<128x1xf32>
    %26 = vector.extract_strided_slice %0 {offsets = [3, 0], sizes = [1, 256], strides = [1, 1]} : vector<4x256xf32> to vector<1x256xf32>
    %27 = vector.broadcast %25 : vector<128x1xf32> to vector<128x256xf32>
    %28 = vector.broadcast %26 : vector<1x256xf32> to vector<128x256xf32>
    %29 = arith.mulf %27, %28 : vector<128x256xf32>
    %30 = arith.addf %24, %29 : vector<128x256xf32>
    %31 = math.exp %30 : vector<128x256xf32>
    %c0_7 = arith.constant 0 : index
    %c0_8 = arith.constant 0 : index
    %32 = vector.load %arg5[%c0_7, %c0_8] : memref<136x128xf32, #tpu.memory_space<vmem>>, vector<136x128xf32>
    %cst = arith.constant dense<0.000000e+00> : vector<136x256xf32>
    %33 = tpu.matmul %32, %31, %cst {dimension_numbers = #tpu.dot_dimension_numbers<[1], [0], [0], [1], [0, 0, 1, 1], [], []>} : vector<136x128xf32>, vector<128x256xf32>, vector<136x256xf32> -> vector<136x256xf32>
    %34 = vector.extract_strided_slice %33 {offsets = [0, 0], sizes = [8, 256], strides = [1, 1]} : vector<136x256xf32> to vector<8x256xf32>
    %c0_9 = arith.constant 0 : index
    %c0_10 = arith.constant 0 : index
    %35 = vector.load %arg7[%c0_9, %c0_10] : memref<8x256xf32, #tpu.memory_space<vmem>>, vector<8x256xf32>
    tpu.vector_store %arg7[%c0_9, %c0_10], %34 {strides = array<i32>} : memref<8x256xf32, #tpu.memory_space<vmem>>, vector<8x256xf32>,
    %c0_11 = arith.constant 0 : index
    %c0_12 = arith.constant 0 : index
    %36 = memref.load %arg6[%c0_11, %c0_12] : memref<1x1xf32, #tpu.memory_space<smem>>
    %37 = vector.extract_strided_slice %33 {offsets = [8, 0], sizes = [128, 256], strides = [1, 1]} : vector<136x256xf32> to vector<128x256xf32>
    %38 = arith.mulf %37, %31 : vector<128x256xf32>
    %cst_13 = arith.constant dense<0.000000e+00> : vector<256xf32>
    %39 = vector.multi_reduction <add>, %38, %cst_13 [0] : vector<128x256xf32> to vector<256xf32>
    %40 = vector.shape_cast %39 : vector<256xf32> to vector<1x256xf32>
    %41 = vector.broadcast %36 : f32 to vector<1x256xf32>
    %42 = arith.subf %41, %40 : vector<1x256xf32>
    %c0_14 = arith.constant 0 : index
    %c0_15 = arith.constant 0 : index
    %43 = vector.load %arg8[%c0_14, %c0_15] : memref<1x256xf32, #tpu.memory_space<vmem>>, vector<1x256xf32>
    tpu.vector_store %arg8[%c0_14, %c0_15], %42 {strides = array<i32>} : memref<1x256xf32, #tpu.memory_space<vmem>>, vector<1x256xf32>,
    return
  }
  func.func @transform_0(%arg0: i32) -> (i32, i32) {
    %c0_i32 = arith.constant 0 : i32
    %c0_i32_0 = arith.constant 0 : i32
    return %c0_i32, %arg0 : i32, i32
  }
  func.func @transform_1(%arg0: i32) -> (i32, i32) {
    %c0_i32 = arith.constant 0 : i32
    %c0_i32_0 = arith.constant 0 : i32
    return %c0_i32, %arg0 : i32, i32
  }
  func.func @transform_2(%arg0: i32) -> (i32, i32) {
    %c0_i32 = arith.constant 0 : i32
    %c0_i32_0 = arith.constant 0 : i32
    %c0_i32_1 = arith.constant 0 : i32
    return %c0_i32, %c0_i32_0 : i32, i32
  }
  func.func @transform_3(%arg0: i32) -> (i32, i32) {
    %c0_i32 = arith.constant 0 : i32
    %c0_i32_0 = arith.constant 0 : i32
    %c0_i32_1 = arith.constant 0 : i32
    return %c0_i32, %c0_i32_0 : i32, i32
  }
  func.func @transform_4(%arg0: i32) -> (i32, i32) {
    %c0_i32 = arith.constant 0 : i32
    %c0_i32_0 = arith.constant 0 : i32
    %c0_i32_1 = arith.constant 0 : i32
    return %c0_i32, %c0_i32_0 : i32, i32
  }
  func.func @transform_5(%arg0: i32) -> (i32, i32) {
    %c0_i32 = arith.constant 0 : i32
    %c0_i32_0 = arith.constant 0 : i32
    %c0_i32_1 = arith.constant 0 : i32
    return %c0_i32, %c0_i32_0 : i32, i32
  }
  func.func @transform_6(%arg0: i32) -> (i32, i32) {
    %c0_i32 = arith.constant 0 : i32
    %c0_i32_0 = arith.constant 0 : i32
    return %c0_i32, %arg0 : i32, i32
  }
  func.func @transform_7(%arg0: i32) -> (i32, i32) {
    %c0_i32 = arith.constant 0 : i32
    %c0_i32_0 = arith.constant 0 : i32
    return %c0_i32, %arg0 : i32, i32
  }
}

</mosaic_0001>

<bundles_post_ra>
// kernel: tpu_custom_call.1
= control target key start
LH: loop header
LB: loop body
LE: loop exit
PB: predicated region body
PF: predicated region fallthrough
CT: control target
= control target key end

     0   :  { %s2619_s0 = inlined_call_operand.vmem [shape: f32[4,512], index: 0, kind: input, shape index: {}]   ;;  %s2620_s1 = inlined_call_operand.vmem [shape: f32[1,512], index: 1, kind: input, shape index: {}]   ;;  %s2621_s2 = inlined_call_operand.vmem [shape: f32[128,4], index: 2, kind: input, shape index: {}]   ;;  %s2622_s3 = inlined_call_operand.vmem [shape: f32[128,1], index: 3, kind: input, shape index: {}]   ;;  %s2623_s4 = inlined_call_operand.vmem [shape: f32[136,128], index: 4, kind: input, shape index: {}]   ;;  %s2624_s5 = inlined_call_operand.<no memory space> [shape: f32[1,1], index: 5, kind: input, shape index: {}]   ;;  %s2625_s6 = inlined_call_operand.hbm [shape: f32[8,512], index: 6, kind: output, shape index: {0}]   ;;  %s2626_s7 = inlined_call_operand.hbm [shape: f32[1,512], index: 7, kind: output, shape index: {1}]  }
   0x1   :  { %13 = sst [smem:[#allocation2]] %s2624_s5 }
   0x2   :  { %14 = vsyncpa [#allocation4], 0 }
   0x3   :  { %16 = vsyncpa [#allocation4 + $0x1], 0 }
   0x4   :  { %17 = vsyncpa [#allocation6], 0 }
   0x5   :  { %19 = vsyncpa [#allocation6 + $0x1], 0  ;;  %s1776_s26 = smov 0   ;;  %s1778_s27 = smov 0  }
   0x6   :  { %s1780_s28 = smov 0   ;;  %s1782_s29 = smov 0  }
   0x7 LB: > { %s1797_s5 = sadd.s32 4294967295, %s1727_s29   ;;  %s1461_s30 = sadd.s32 4294967294, %s1727_s29   ;;  %s1727_s29 = sphi %s1782_s29, %s2640_s29   ;;  %s1723_s28 = sphi %s1780_s28, %s2639_s28   ;;  %s1719_s27 = sphi %s1778_s27, %s2638_s27   ;;  %s1715_s26 = sphi %s1776_s26, %s2637_s26  }
   0x8   : > { %s1801_s8 = sadd.s32 1, %s1727_s29   ;;  %s168_s9 = sadd.s32 1, %s1723_s28 }
   0x9   : > { %s165_s10 = ssub.s32 %s1727_s29, %s1801_s8  ;;  %p178_p0 = scmp.ne.s32.totalorder %s1723_s28, %s1719_s27 }
   0xa   : > { %p166_p1 = scmp.eq.s32.totalorder %s165_s10, 0  ;;  %p179_p2 = scmp.eq.s32.totalorder %s1797_s5, 1 }
   0xb   : > { %p184_p3 = scmp.ne.s32.totalorder %s1719_s27, %s1715_s26  ;;  %p185_p4 = scmp.eq.s32.totalorder %s1461_s30, 1 }
   0xc   : > { %s1812_s11 = scalar_select %p166_p1, %s1723_s28, %s168_s9  }
   0xd   : > { %p1814_p5 = por %p179_p2, %p178_p0  ;;  %p1818_p6 = por %p185_p4, %p184_p3 }
   0xe   : > { %p1464_p7 = scmp.ge.s32.totalorder %s1727_s29, 1  ;;  %p258_p8 = scmp.lt.s32.totalorder %s1727_s29, 3 }
  0x10   : > { %p259_p9 = pnand %p1464_p7, %p258_p8 }
  0x12   : > { %262 = sbr.rel (%p259_p9) target bundleno = 600 (0x258), region = 44 }
  0x17   : > { %v333_v0 = vld [vmem:[%s2622_s3 + $0x20] sm:$0xff]  ;;  %v331_v1 = vld [vmem:[%s2622_s3 + $0x10] sm:$0xff]  ;;  %v1729_v3 = vmov 0   ;;  %v334_v4 = vld [vmem:[%s2622_s3 + $0x28] sm:$0xff]  ;;  %v1730_v32 = vmov 1   ;;  %v1731_v34 = vmov 2  }
  0x18   : > { %v329_v2 = vld [vmem:[%s2622_s3] sm:$0xff]  ;;  %1560 = vset.pattern.permute.xlu2 %v1729_v3  ;;  %1559 = vset.pattern.permute.xlu1 %v1729_v3  ;;  %v332_v5 = vld [vmem:[%s2622_s3 + $0x18] sm:$0xff]  ;;  %v330_v6 = vld [vmem:[%s2622_s3 + $0x8] sm:$0xff]  ;;  %v2627_v37 = vmov 3   ;;  %s1965_s18 = sshll.u32 %s1797_s5, 1  ;;  %s1653_s17 = scalar_lea.hbm %s2625_s6, 32 }
  0x19   : > { %1558 = vset.pattern.permute.xlu0 %v1729_v3  ;;  %368 = vperm.xlu2 %1560, %v333_v0   ;;  %v337_v7 = vld [vmem:[%s2622_s3 + $0x40] sm:$0xff]  ;;  %v336_v8 = vld [vmem:[%s2622_s3 + $0x38] sm:$0xff]  ;;  %v335_v9 = vld [vmem:[%s2622_s3 + $0x30] sm:$0xff]  ;;  %p300_p10 = scmp.lt.s32.totalorder %s1965_s18, 3 }
  0x1a   : > { %358 = vperm.xlu1 %1559, %v331_v1   ;;  %348 = vperm.xlu0 %1558, %v329_v2   ;;  %v340_v10 = vld [vmem:[%s2622_s3 + $0x58] sm:$0xff]  ;;  %v339_v11 = vld [vmem:[%s2622_s3 + $0x50] sm:$0xff]  ;;  %v338_v12 = vld [vmem:[%s2622_s3 + $0x48] sm:$0xff] }
  0x1b   : > { %v343_v13 = vld [vmem:[%s2622_s3 + $0x70] sm:$0xff]  ;;  %v342_v14 = vld [vmem:[%s2622_s3 + $0x68] sm:$0xff]  ;;  %v341_v15 = vld [vmem:[%s2622_s3 + $0x60] sm:$0xff]  ;;  %s301_s19 = scalar_select %p300_p10, %s1965_s18, 3 }
  0x1c   : > { %v1875_v16 = vld [vmem:[%s2621_s2 + $0x8] sm:$0xff]  ;;  %v344_v17 = vld [vmem:[%s2622_s3 + $0x78] sm:$0xff]  ;;  %v1883_v18 = vld [vmem:[%s2621_s2] sm:$0xff] }
  0x1d   : > { %v1890_v19 = vld [vmem:[%s2621_s2 + $0x20] sm:$0xff]  ;;  %v1895_v20 = vld [vmem:[%s2621_s2 + $0x10] sm:$0xff]  ;;  %v1900_v21 = vld [vmem:[%s2621_s2 + $0x18] sm:$0xff]  ;;  %s1468_s20 = sshll.u32 %s301_s19, 2  ;;  %s308_s30 = scalar_lea.vmem %s2620_s1, %s301_s19 }
  0x1e   : > { %v1908_v22 = vld [vmem:[%s2621_s2 + $0x38] sm:$0xff]  ;;  %v1913_v23 = vld [vmem:[%s2621_s2 + $0x28] sm:$0xff]  ;;  %v1918_v24 = vld [vmem:[%s2621_s2 + $0x30] sm:$0xff]  ;;  %s303_s23 = scalar_lea.vmem %s2619_s0, %s1468_s20  ;;  %s2524_s19 = sand.u32 1, %s1719_s27  }
  0x1f   : > { %v1926_v25 = vld [vmem:[%s2621_s2 + $0x50] sm:$0xff]  ;;  %v1931_v26 = vld [vmem:[%s2621_s2 + $0x40] sm:$0xff]  ;;  %v1936_v27 = vld [vmem:[%s2621_s2 + $0x48] sm:$0xff]  ;;  %s1477_s20 = sshll.u32 %s1797_s5, 4  ;;  %s1465_s21 = sshll.u32 %s2524_s19, 4 }
  0x20   : > { %v327_v28 = vld [vmem:[%s2621_s2 + $0x70] sm:$0xff]  ;;  %v1947_v29 = vld [vmem:[%s2621_s2 + $0x58] sm:$0xff]  ;;  %v326_v31 = vld [vmem:[%s2621_s2 + $0x68] sm:$0xff]  ;;  %s1341_s24 = scalar_lea.hbm %s2625_s6, %s1477_s20  ;;  %s291_s25 = scalar_lea.vmem [#allocation3], %s1465_s21 }
  0x21   : > { %373 = vperm.xlu2 %1560, %v334_v4   ;;  %v328_v30 = vld [vmem:[%s2621_s2 + $0x78] sm:$0xff]  ;;  %v325_v33 = vld [vmem:[%s2621_s2 + $0x60] sm:$0xff]  ;;  %s1345_s9 = sshll.u32 %s1341_s24, 4  ;;  %s1325_s10 = scalar_lea.sflag [#allocation4], %s2524_s19  ;;  %s1346_s9 = int_to_ptr.hbm [resolvable:$true] %s1345_s9 }
  0x22   : > { %363 = vperm.xlu1 %1559, %v332_v5   ;;  %353 = vperm.xlu0 %1558, %v330_v6   ;;  %v1982_v42 = vld [vmem:[%s303_s23] sm:$0xff]  ;;  %s1647_s14 = sshra.s32 %s1346_s9, 4  ;;  %s1648_s14 = int_to_ptr.hbm [resolvable:$true] %s1647_s14 }
  0x23   : > { %v544_v46 = vperm.slane %v1982_v42, 0  ;;  %v545_v47 = vperm.slane %v1982_v42, 4  ;;  %v345_v48 = vld [vmem:[%s308_s30] sm:$0x3]  ;;  %s1343_s30 = sshll.u32 %s291_s25, 4  ;;  %s1649_s15 = scalar_lea.hbm %s1648_s14, 16  ;;  %s1344_s30 = int_to_ptr.vmem [resolvable:$true] %s1343_s30 }
  0x24   : > { %v1999_v51 = vperm.slane %v345_v48, 0  ;;  %v2001_v52 = vperm.slane %v345_v48, 1  ;;  %p1650_p11 = scmp.ne.s32.totalorder %s1648_s14, %s1649_s15  ;;  %p1654_p0 = scmp.lt.s32.totalorder %s1648_s14, %s2625_s6 }
  0x25   : > { %v1995_v49 = vperm.slane %v544_v46, 0  ;;  %v1997_v50 = vperm.slane %v545_v47, 0  ;;  %p1655_p1 = scmp.lt.s32.totalorder %s1653_s17, %s1649_s15 }
  0x26   : > { %p1651_p12 = pnand %p1650_p11, %p1814_p5 }
  0x27   : > { %p1656_p2 = por %p1655_p1, %p1654_p0 }
  0x28   : > { %p1652_p13 = pneg %p1651_p12 }
  0x29   : > { %388 = vperm.xlu2 %1560, %v337_v7  }
  0x2a   : > { %383 = vperm.xlu1 %1559, %v336_v8   ;;  %378 = vperm.xlu0 %1558, %v335_v9   ;;  %p1657_p3 = pnand %p1656_p2, %p1652_p13 }
  0x31   : > { %403 = vperm.xlu2 %1560, %v340_v10  }
  0x32   : > { %398 = vperm.xlu1 %1559, %v339_v11   ;;  %393 = vperm.xlu0 %1558, %v338_v12  }
  0x39   : > { %418 = vperm.xlu2 %1560, %v343_v13  }
  0x3a   : > { %413 = vperm.xlu1 %1559, %v342_v14   ;;  %408 = vperm.xlu0 %1558, %v341_v15  }
  0x41   : > { %470 = vperm.xlu2 %1560, %v1875_v16  }
  0x42   : > { %423 = vperm.xlu0 %1558, %v344_v17   ;;  %465 = vperm.xlu1 %1559, %v1883_v18  }
  0x49   : > { %485 = vperm.xlu2 %1560, %v1890_v19  }
  0x4a   : > { %475 = vperm.xlu0 %1558, %v1895_v20   ;;  %480 = vperm.xlu1 %1559, %v1900_v21  }
  0x51   : > { %500 = vperm.xlu2 %1560, %v1908_v22  }
  0x52   : > { %490 = vperm.xlu0 %1558, %v1913_v23   ;;  %495 = vperm.xlu1 %1559, %v1918_v24  }
  0x59   : > { %515 = vperm.xlu2 %1560, %v1926_v25  }
  0x5a   : > { %505 = vperm.xlu0 %1558, %v1931_v26   ;;  %510 = vperm.xlu1 %1559, %v1936_v27  }
  0x61   : > { %535 = vperm.xlu2 %1560, %v327_v28  }
  0x62   : > { %520 = vperm.xlu0 %1558, %v1947_v29   ;;  %540 = vperm.xlu1 %1559, %v328_v30  }
  0x69   : > { %1562 = vset.pattern.permute.xlu2 %v1730_v32 }
  0x6a   : > { %1561 = vset.pattern.permute.xlu0 %v1730_v32  ;;  %530 = vperm.xlu1 %1559, %v326_v31  }
  0x6b   : > { %675 = vperm.xlu0 %1561, %v328_v30   ;;  %671 = vperm.xlu2 %1562, %v327_v28  }
  0x72   : > { %1563 = vset.pattern.permute.xlu1 %v1731_v34 }
  0x73   : > { %667 = vperm.xlu0 %1561, %v326_v31   ;;  %1564 = vset.pattern.permute.xlu2 %v1729_v3  ;;  %v369_v35 = vpop.permute.xlu2 %368 }
  0x74   : > { %809 = vperm.xlu1 %1563, %v328_v30   ;;  %525 = vperm.xlu2 %1564, %v325_v33   ;;  %v439_v63 = vadd.f32 %v1999_v51, %v369_v35  ;;  %v440_v0 = vadd.f32 %v2001_v52, %v369_v35 }
  0x7b   : > { %663 = vperm.xlu0 %1561, %v325_v33   ;;  %v1961_v36 = vpop.permute.xlu2 %373 }
  0x7c   : > { %805 = vperm.xlu1 %1563, %v327_v28   ;;  %1565 = vset.pattern.permute.xlu2 %v2627_v37 }
  0x7d   : > { %943 = vperm.xlu2 %1565, %v328_v30  }
  0x83   : > { %659 = vperm.xlu0 %1561, %v1947_v29   ;;  %v1968_v38 = vpop.permute.xlu2 %388 }
  0x84   : > { %801 = vperm.xlu1 %1563, %v326_v31  }
  0x85   : > { %939 = vperm.xlu2 %1565, %v327_v28  }
  0x8b   : > { %655 = vperm.xlu0 %1561, %v1926_v25   ;;  %v1973_v39 = vpop.permute.xlu2 %403 }
  0x8c   : > { %797 = vperm.xlu1 %1563, %v325_v33   ;;  %v1975_v40 = vpop.permute.xlu1 %358  ;;  %v1977_v41 = vpop.permute.xlu0 %348 }
  0x8d   : > { %935 = vperm.xlu2 %1565, %v326_v31   ;;  %v431_v32 = vadd.f32 %v1999_v51, %v1977_v41 }
  0x93   : > { %651 = vperm.xlu0 %1561, %v1936_v27   ;;  %v1985_v43 = vpop.permute.xlu2 %418 }
  0x94   : > { %793 = vperm.xlu1 %1563, %v1947_v29   ;;  %v1991_v44 = vpop.permute.xlu1 %363  ;;  %v354_v45 = vpop.permute.xlu0 %353 }
  0x95   : > { %931 = vperm.xlu2 %1565, %v325_v33   ;;  %v433_v54 = vadd.f32 %v1999_v51, %v354_v45  ;;  %v434_v55 = vadd.f32 %v2001_v52, %v354_v45  ;;  %v432_v33 = vadd.f32 %v2001_v52, %v1977_v41  ;;  %v435_v41 = vadd.f32 %v1999_v51, %v1975_v40 }
  0x9b   : > { %647 = vperm.xlu0 %1561, %v1931_v26   ;;  %v471_v53 = vpop.permute.xlu2 %470 }
  0x9c   : > { %789 = vperm.xlu1 %1563, %v1926_v25   ;;  %v384_v56 = vpop.permute.xlu1 %383  ;;  %v2007_v57 = vpop.permute.xlu0 %378  ;;  %v552_v58 = vmul.f32 %v1995_v49, %v471_v53  ;;  %v553_v59 = vmul.f32 %v1997_v50, %v471_v53 }
  0x9d   : > { %927 = vperm.xlu2 %1565, %v1947_v29   ;;  %v445_v8 = vadd.f32 %v1999_v51, %v384_v56  ;;  %v446_v9 = vadd.f32 %v2001_v52, %v384_v56  ;;  %v438_v56 = vadd.f32 %v2001_v52, %v1991_v44 }
  0x9e   : > { %v2012_v60 = vadd.f32 %v552_v58, %v433_v54  ;;  %v2014_v61 = vadd.f32 %v553_v59, %v434_v55  ;;  %v436_v55 = vadd.f32 %v2001_v52, %v1975_v40 }
  0xa0   : > { %2632 = vst [vmem:[#allocation9_spill] sm:$0xff] %v2014_v61  ;;  %v2633_v61 = vmov 3  }
  0xa3   : > { %643 = vperm.xlu0 %1561, %v1908_v22   ;;  %v486_v62 = vpop.permute.xlu2 %485 }
  0xa4   : > { %785 = vperm.xlu1 %1563, %v1936_v27   ;;  %v399_v1 = vpop.permute.xlu1 %398  ;;  %v2020_v2 = vpop.permute.xlu0 %393  ;;  %v558_v3 = vmul.f32 %v1995_v49, %v486_v62  ;;  %v559_v4 = vmul.f32 %v1997_v50, %v486_v62 }
  0xa5   : > { %923 = vperm.xlu2 %1565, %v1926_v25   ;;  %v451_v25 = vadd.f32 %v1999_v51, %v399_v1  ;;  %v452_v28 = vadd.f32 %v2001_v52, %v399_v1 }
  0xa6   : > { %v2025_v5 = vadd.f32 %v558_v3, %v439_v63  ;;  %v2027_v6 = vadd.f32 %v559_v4, %v440_v0 }
  0xab   : > { %639 = vperm.xlu0 %1561, %v1918_v24   ;;  %v501_v7 = vpop.permute.xlu2 %500 }
  0xac   : > { %781 = vperm.xlu1 %1563, %v1931_v26   ;;  %v2033_v10 = vpop.permute.xlu1 %413  ;;  %v2035_v11 = vpop.permute.xlu0 %408  ;;  %v564_v12 = vmul.f32 %v1995_v49, %v501_v7  ;;  %v565_v13 = vmul.f32 %v1997_v50, %v501_v7  ;;  %v441_v7 = vadd.f32 %v1999_v51, %v1961_v36 }
  0xad   : > { %919 = vperm.xlu2 %1565, %v1936_v27  }
  0xae   : > { %v2040_v14 = vadd.f32 %v564_v12, %v445_v8  ;;  %v2042_v15 = vadd.f32 %v565_v13, %v446_v9  ;;  %v442_v8 = vadd.f32 %v2001_v52, %v1961_v36  ;;  %v443_v9 = vadd.f32 %v1999_v51, %v2007_v57 }
  0xb3   : > { %635 = vperm.xlu0 %1561, %v1913_v23   ;;  %v516_v17 = vpop.permute.xlu2 %515 }
  0xb4   : > { %777 = vperm.xlu1 %1563, %v1908_v22   ;;  %v2048_v29 = vpop.permute.xlu0 %423  ;;  %v570_v30 = vmul.f32 %v1995_v49, %v516_v17  ;;  %v571_v31 = vmul.f32 %v1997_v50, %v516_v17  ;;  %v466_v27 = vpop.permute.xlu1 %465 }
  0xb5   : > { %v550_v35 = vmul.f32 %v1995_v49, %v466_v27  ;;  %v551_v45 = vmul.f32 %v1997_v50, %v466_v27  ;;  %915 = vperm.xlu2 %1565, %v1931_v26   ;;  %v437_v26 = vadd.f32 %v1999_v51, %v1991_v44 }
  0xb6   : > { %v2059_v46 = vadd.f32 %v570_v30, %v451_v25  ;;  %v2061_v47 = vadd.f32 %v571_v31, %v452_v28 }
  0xb7   : > { %v2063_v48 = vadd.f32 %v550_v35, %v431_v32  ;;  %v2065_v53 = vadd.f32 %v551_v45, %v432_v33  ;;  %v447_v33 = vadd.f32 %v1999_v51, %v1968_v38  ;;  %v448_v35 = vadd.f32 %v2001_v52, %v1968_v38 }
  0xb8   : > { %v450_v45 = vadd.f32 %v2001_v52, %v2020_v2 }
  0xbb   : > { %631 = vperm.xlu0 %1561, %v1890_v19   ;;  %v2068_v54 = vpop.permute.xlu2 %535 }
  0xbc   : > { %773 = vperm.xlu1 %1563, %v1918_v24   ;;  %v476_v58 = vpop.permute.xlu0 %475  ;;  %v481_v59 = vpop.permute.xlu1 %480  ;;  %v578_v37 = vmul.f32 %v1995_v49, %v2068_v54 }
  0xbd   : > { %v554_v62 = vmul.f32 %v1995_v49, %v476_v58  ;;  %v555_v63 = vmul.f32 %v1997_v50, %v476_v58  ;;  %v556_v0 = vmul.f32 %v1995_v49, %v481_v59  ;;  %v557_v1 = vmul.f32 %v1997_v50, %v481_v59  ;;  %911 = vperm.xlu2 %1565, %v1908_v22  }
  0xbe   : > { %v444_v22 = vadd.f32 %v2001_v52, %v2007_v57 }
  0xbf   : > { %v2084_v40 = vadd.f32 %v554_v62, %v435_v41  ;;  %v2086_v3 = vadd.f32 %v555_v63, %v436_v55  ;;  %v2088_v4 = vadd.f32 %v556_v0, %v437_v26  ;;  %v2090_v44 = vadd.f32 %v557_v1, %v438_v56 }
  0xc3   : > { %627 = vperm.xlu0 %1561, %v1900_v21  }
  0xc4   : > { %769 = vperm.xlu1 %1563, %v1913_v23   ;;  %v491_v12 = vpop.permute.xlu0 %490  ;;  %v496_v13 = vpop.permute.xlu1 %495 }
  0xc5   : > { %v560_v17 = vmul.f32 %v1995_v49, %v491_v12  ;;  %v561_v25 = vmul.f32 %v1997_v50, %v491_v12  ;;  %v562_v28 = vmul.f32 %v1995_v49, %v496_v13  ;;  %v563_v30 = vmul.f32 %v1997_v50, %v496_v13  ;;  %907 = vperm.xlu2 %1565, %v1918_v24   ;;  %v2107_v36 = vpop.permute.xlu2 %671 }
  0xc6   : > { %v449_v24 = vadd.f32 %v1999_v51, %v2020_v2  ;;  %v946_v13 = vperm.slane %v1982_v42, 3 }
  0xc7   : > { %v2109_v31 = vadd.f32 %v560_v17, %v441_v7  ;;  %v2111_v27 = vadd.f32 %v561_v25, %v442_v8  ;;  %v2113_v57 = vadd.f32 %v562_v28, %v443_v9  ;;  %v2115_v32 = vadd.f32 %v563_v30, %v444_v22 }
  0xc8   : > { %v678_v9 = vperm.slane %v1982_v42, 1  ;;  %v679_v22 = vperm.slane %v1982_v42, 5  ;;  %v947_v17 = vperm.slane %v1982_v42, 7  ;;  %v813_v28 = vperm.slane %v1982_v42, 6 }
  0xca   : > { %v2158_v30 = vperm.slane %v678_v9, 1 }
  0xcb   : > { %623 = vperm.xlu0 %1561, %v1895_v20  }
  0xcc   : > { %765 = vperm.xlu1 %1563, %v1890_v19   ;;  %v506_v41 = vpop.permute.xlu0 %505  ;;  %v511_v55 = vpop.permute.xlu1 %510 }
  0xcd   : > { %v566_v26 = vmul.f32 %v1995_v49, %v506_v41  ;;  %v567_v56 = vmul.f32 %v1997_v50, %v506_v41  ;;  %v568_v58 = vmul.f32 %v1995_v49, %v511_v55  ;;  %v569_v59 = vmul.f32 %v1997_v50, %v511_v55  ;;  %903 = vperm.xlu2 %1565, %v1913_v23  }
  0xce   : > { %v2132_v38 = vpop.permute.xlu2 %525  ;;  %v2168_v41 = vperm.slane %v946_v13, 3  ;;  %v2170_v55 = vperm.slane %v947_v17, 3 }
  0xcf   : > { %v2134_v62 = vadd.f32 %v566_v26, %v447_v33  ;;  %v2136_v63 = vadd.f32 %v567_v56, %v448_v35  ;;  %v2138_v2 = vadd.f32 %v568_v58, %v449_v24  ;;  %v2140_v0 = vadd.f32 %v569_v59, %v450_v45 }
  0xd0   : > { %v2160_v33 = vperm.slane %v679_v22, 1  ;;  %v462_v45 = vadd.f32 %v2001_v52, %v2048_v29  ;;  %v2177_v58 = vperm.slane %v813_v28, 2 }
  0xd3   : > { %619 = vperm.xlu0 %1561, %v1875_v16  }
  0xd4   : > { %761 = vperm.xlu1 %1563, %v1900_v21   ;;  %v2144_v1 = vpop.permute.xlu0 %520  ;;  %v541_v7 = vpop.permute.xlu1 %540 }
  0xd5   : > { %899 = vperm.xlu2 %1565, %v1890_v19   ;;  %v812_v19 = vperm.slane %v1982_v42, 2  ;;  %v580_v35 = vmul.f32 %v1995_v49, %v541_v7  ;;  %v581_v24 = vmul.f32 %v1997_v50, %v541_v7 }
  0xd7   : > { %v944_v23 = vpop.permute.xlu2 %943  ;;  %v2175_v56 = vperm.slane %v812_v19, 2 }
  0xd8   : > { %v982_v9 = vmul.f32 %v2168_v41, %v944_v23  ;;  %v983_v22 = vmul.f32 %v2170_v55, %v944_v23  ;;  %v460_v23 = vadd.f32 %v2001_v52, %v1985_v43 }
  0xdb   : > { %615 = vperm.xlu0 %1561, %v1883_v18  }
  0xdc   : > { %757 = vperm.xlu1 %1563, %v1895_v20   ;;  %v2149_v8 = vpop.permute.xlu1 %530 }
  0xdd   : > { %v676_v12 = vpop.permute.xlu0 %675  ;;  %895 = vperm.xlu2 %1565, %v1900_v21   ;;  %v461_v21 = vadd.f32 %v1999_v51, %v2048_v29  ;;  %v613_v29 = vadd.f32 %v581_v24, %v462_v45  ;;  %v712_v45 = vmul.f32 %v2158_v30, %v2107_v36 }
  0xde   : > { %v714_v42 = vmul.f32 %v2158_v30, %v676_v12  ;;  %v715_v26 = vmul.f32 %v2160_v33, %v676_v12 }
  0xdf   : > { %v940_v25 = vpop.permute.xlu2 %939  ;;  %v612_v59 = vadd.f32 %v580_v35, %v461_v21  ;;  %v579_v35 = vmul.f32 %v1997_v50, %v2068_v54  ;;  %v459_v21 = vadd.f32 %v1999_v51, %v1985_v43 }
  0xe1   : > { %v746_v13 = vadd.f32 %v714_v42, %v612_v59  ;;  %v713_v42 = vmul.f32 %v2160_v33, %v2107_v36 }
  0xe3   : > { %1566 = vset.pattern.permute.xlu0 %v1731_v34  ;;  %v747_v34 = vadd.f32 %v715_v26, %v613_v29  ;;  %v610_v29 = vadd.f32 %v578_v37, %v459_v21  ;;  %v458_v21 = vadd.f32 %v2001_v52, %v2033_v10 }
  0xe4   : > { %753 = vperm.xlu1 %1563, %v1875_v16   ;;  %749 = vperm.xlu0 %1566, %v1883_v18  }
  0xe5   : > { %v668_v7 = vpop.permute.xlu0 %667  ;;  %891 = vperm.xlu2 %1565, %v1895_v20   ;;  %v744_v43 = vadd.f32 %v712_v45, %v610_v29 }
  0xe6   : > { %v810_v12 = vpop.permute.xlu1 %809 }
  0xe7   : > { %v848_v17 = vmul.f32 %v2175_v56, %v810_v12  ;;  %v849_v19 = vmul.f32 %v2177_v58, %v810_v12  ;;  %v936_v28 = vpop.permute.xlu2 %935  ;;  %v611_v12 = vadd.f32 %v579_v35, %v460_v23  ;;  %v711_v23 = vmul.f32 %v2160_v33, %v668_v7 }
  0xe9   : > { %v880_v24 = vadd.f32 %v848_v17, %v746_v13  ;;  %v881_v20 = vadd.f32 %v849_v19, %v747_v34  ;;  %v745_v17 = vadd.f32 %v713_v42, %v611_v12  ;;  %v980_v19 = vmul.f32 %v2168_v41, %v940_v25 }
  0xeb   : > { %v1014_v26 = vadd.f32 %v982_v9, %v880_v24  ;;  %v1015_v59 = vadd.f32 %v983_v22, %v881_v20  ;;  %v981_v9 = vmul.f32 %v2170_v55, %v940_v25  ;;  %v457_v20 = vadd.f32 %v1999_v51, %v2033_v10 }
  0xec   : > { %1567 = vset.pattern.permute.xlu1 %v2633_v61  ;;  %1568 = vset.pattern.permute.xlu0 %v2633_v61  ;;  %v710_v25 = vmul.f32 %v2158_v30, %v668_v7 }
  0xed   : > { %v1076_v54 = vmul.f32 1.442695, %v1014_v26  ;;  %v1078_v13 = vmul.f32 1.442695, %v1015_v59  ;;  %887 = vperm.xlu1 %1567, %v1875_v16   ;;  %v664_v34 = vpop.permute.xlu0 %663  ;;  %883 = vperm.xlu2 %1565, %v1883_v18   ;;  %v576_v16 = vmul.f32 %v1995_v49, %v2149_v8  ;;  %v577_v18 = vmul.f32 %v1997_v50, %v2149_v8 }
  0xee   : > { %v806_v36 = vpop.permute.xlu1 %805 }
  0xef   : > { %1569 = vpow2.f32 %v1076_v54  ;;  %v846_v37 = vmul.f32 %v2175_v56, %v806_v36  ;;  %v847_v22 = vmul.f32 %v2177_v58, %v806_v36  ;;  %v2206_v61 = vpop.permute.xlu2 %931  ;;  %v608_v26 = vadd.f32 %v576_v16, %v457_v20 }
  0xf0   : > { %1571 = vpow2.f32 %v1078_v13  ;;  %v609_v29 = vadd.f32 %v577_v18, %v458_v21  ;;  %v979_v16 = vmul.f32 %v2170_v55, %v936_v28  ;;  %v708_v20 = vmul.f32 %v2158_v30, %v664_v34 }
  0xf1   : > { %v878_v35 = vadd.f32 %v846_v37, %v744_v43  ;;  %v879_v24 = vadd.f32 %v847_v22, %v745_v17  ;;  %v742_v43 = vadd.f32 %v710_v25, %v608_v26  ;;  %v575_v37 = vmul.f32 %v1997_v50, %v2132_v38 }
  0xf2   : > { %v743_v10 = vadd.f32 %v711_v23, %v609_v29  ;;  %v978_v22 = vmul.f32 %v2168_v41, %v936_v28  ;;  %v456_v25 = vadd.f32 %v2001_v52, %v2035_v11  ;;  %v709_v21 = vmul.f32 %v2160_v33, %v664_v34 }
  0xf3   : > { %v1012_v45 = vadd.f32 %v980_v19, %v878_v35  ;;  %v1013_v42 = vadd.f32 %v981_v9, %v879_v24  ;;  %v574_v9 = vmul.f32 %v1995_v49, %v2132_v38  ;;  %v455_v24 = vadd.f32 %v1999_v51, %v2035_v11 }
  0xf4   : > { %v607_v26 = vadd.f32 %v575_v37, %v456_v25  ;;  %v976_v37 = vmul.f32 %v2168_v41, %v2206_v61 }
  0xf5   : > { %v2218_v59 = vpop.eup %1569  ;;  %v1072_v12 = vmul.f32 1.442695, %v1012_v45  ;;  %v1074_v8 = vmul.f32 1.442695, %v1013_v42  ;;  %v660_v54 = vpop.permute.xlu0 %659  ;;  %v606_v38 = vadd.f32 %v574_v9, %v455_v24  ;;  %v573_v9 = vmul.f32 %v1997_v50, %v2144_v1 }
  0xf6   : > { %v2220_v13 = vpop.eup %1571  ;;  %v802_v17 = vpop.permute.xlu1 %801  ;;  %1097 = vmatpush.msra.mxu0 %v2218_v59  ;;  %1478 = vmatpush.msra.mxu2 %v2218_v59  ;;  %v741_v11 = vadd.f32 %v709_v21, %v607_v26  ;;  %v706_v24 = vmul.f32 %v2158_v30, %v660_v54 }
  0xf7   : > { %2634 = vst [vmem:[#allocation10_spill] sm:$0xff] %v2220_v13  ;;  %1573 = vpow2.f32 %v1072_v12  ;;  %v844_v7 = vmul.f32 %v2175_v56, %v802_v17  ;;  %v845_v19 = vmul.f32 %v2177_v58, %v802_v17  ;;  %1165 = vmatpush.msra.mxu1 %v2220_v13  ;;  %1494 = vmatpush.msra.mxu3 %v2220_v13  ;;  %v2228_v36 = vpop.permute.xlu2 %927 }
  0xf8   : > { %1575 = vpow2.f32 %v1074_v8 }
  0xf9   : > { %v876_v18 = vadd.f32 %v844_v7, %v742_v43  ;;  %v877_v35 = vadd.f32 %v845_v19, %v743_v10  ;;  %v740_v43 = vadd.f32 %v708_v20, %v606_v38  ;;  %v572_v19 = vmul.f32 %v1995_v49, %v2144_v1 }
  0xfa   : > { %v454_v49 = vadd.f32 %v2001_v52, %v1973_v39  ;;  %v707_v20 = vmul.f32 %v2160_v33, %v660_v54 }
  0xfb   : > { %v1010_v23 = vadd.f32 %v978_v22, %v876_v18  ;;  %v1011_v45 = vadd.f32 %v979_v16, %v877_v35  ;;  %v977_v22 = vmul.f32 %v2170_v55, %v2206_v61  ;;  %v453_v35 = vadd.f32 %v1999_v51, %v1973_v39 }
  0xfd   : > { %v2242_v42 = vpop.eup %1573  ;;  %v1068_v29 = vmul.f32 1.442695, %v1010_v23  ;;  %v1070_v28 = vmul.f32 1.442695, %v1011_v45  ;;  %v656_v12 = vpop.permute.xlu0 %655  ;;  %v604_v25 = vadd.f32 %v572_v19, %v453_v35  ;;  %v605_v23 = vadd.f32 %v573_v9, %v454_v49 }
  0xfe   : > { %v2244_v8 = vpop.eup %1575  ;;  %v798_v17 = vpop.permute.xlu1 %797  ;;  %1098 = vmatpush.msra.mxu0 %v2242_v42  ;;  %1479 = vmatpush.msra.mxu2 %v2242_v42  ;;  %v705_v19 = vmul.f32 %v2160_v33, %v656_v12 }
  0xff   : > { %1577 = vpow2.f32 %v1068_v29  ;;  %v842_v34 = vmul.f32 %v2175_v56, %v798_v17  ;;  %v843_v10 = vmul.f32 %v2177_v58, %v798_v17  ;;  %1166 = vmatpush.msra.mxu1 %v2244_v8  ;;  %1495 = vmatpush.msra.mxu3 %v2244_v8  ;;  %v924_v7 = vpop.permute.xlu2 %923  ;;  %v738_v29 = vadd.f32 %v706_v24, %v604_v25 }
 0x100   : > { %1579 = vpow2.f32 %v1070_v28  ;;  %v739_v39 = vadd.f32 %v707_v20, %v605_v23  ;;  %v975_v17 = vmul.f32 %v2170_v55, %v2228_v36 }
 0x101   : > { %v874_v16 = vadd.f32 %v842_v34, %v740_v43  ;;  %v875_v18 = vadd.f32 %v843_v10, %v741_v11  ;;  %v974_v43 = vmul.f32 %v2168_v41, %v2228_v36  ;;  %v704_v10 = vmul.f32 %v2158_v30, %v656_v12 }
 0x102   : > { %v737_v36 = vadd.f32 %v705_v19, %v2061_v47 }
 0x103   : > { %v1008_v50 = vadd.f32 %v976_v37, %v874_v16  ;;  %v1009_v1 = vadd.f32 %v977_v22, %v875_v18  ;;  %v736_v49 = vadd.f32 %v704_v10, %v2059_v46  ;;  %v973_v46 = vmul.f32 %v2170_v55, %v924_v7 }
 0x105   : > { %v2266_v21 = vpop.eup %1577  ;;  %v1064_v45 = vmul.f32 1.442695, %v1008_v50  ;;  %v1066_v61 = vmul.f32 1.442695, %v1009_v1  ;;  %v652_v38 = vpop.permute.xlu0 %651  ;;  %v972_v1 = vmul.f32 %v2168_v41, %v924_v7 }
 0x106   : > { %v2268_v26 = vpop.eup %1579  ;;  %v794_v51 = vpop.permute.xlu1 %793  ;;  %1099 = vmatpush.msra.mxu0 %v2266_v21  ;;  %1480 = vmatpush.msra.mxu2 %v2266_v21  ;;  %v703_v47 = vmul.f32 %v2160_v33, %v652_v38 }
 0x107   : > { %1581 = vpow2.f32 %v1064_v45  ;;  %v840_v52 = vmul.f32 %v2175_v56, %v794_v51  ;;  %v841_v54 = vmul.f32 %v2177_v58, %v794_v51  ;;  %1167 = vmatpush.msra.mxu1 %v2268_v26  ;;  %1496 = vmatpush.msra.mxu3 %v2268_v26  ;;  %v920_v28 = vpop.permute.xlu2 %919  ;;  %v702_v45 = vmul.f32 %v2158_v30, %v652_v38 }
 0x108   : > { %1583 = vpow2.f32 %v1066_v61  ;;  %v735_v7 = vadd.f32 %v703_v47, %v2140_v0  ;;  %v970_v19 = vmul.f32 %v2168_v41, %v920_v28 }
 0x109   : > { %v872_v11 = vadd.f32 %v840_v52, %v738_v29  ;;  %v873_v34 = vadd.f32 %v841_v54, %v739_v39 }
 0x10b   : > { %v1006_v9 = vadd.f32 %v974_v43, %v872_v11  ;;  %v1007_v37 = vadd.f32 %v975_v17, %v873_v34  ;;  %v734_v11 = vadd.f32 %v702_v45, %v2138_v2  ;;  %v971_v2 = vmul.f32 %v2170_v55, %v920_v28 }
 0x10d   : > { %v2282_v22 = vpop.eup %1581  ;;  %v1060_v16 = vmul.f32 1.442695, %v1006_v9  ;;  %v1062_v18 = vmul.f32 1.442695, %v1007_v37  ;;  %v648_v35 = vpop.permute.xlu0 %647 }
 0x10e   : > { %v2284_v24 = vpop.eup %1583  ;;  %v790_v20 = vpop.permute.xlu1 %789  ;;  %1100 = vmatpush.msra.mxu0 %v2282_v22  ;;  %1481 = vmatpush.msra.mxu2 %v2282_v22  ;;  %v701_v0 = vmul.f32 %v2160_v33, %v648_v35 }
 0x10f   : > { %1585 = vpow2.f32 %v1060_v16  ;;  %v838_v12 = vmul.f32 %v2175_v56, %v790_v20  ;;  %v839_v50 = vmul.f32 %v2177_v58, %v790_v20  ;;  %1168 = vmatpush.msra.mxu1 %v2284_v24  ;;  %1497 = vmatpush.msra.mxu3 %v2284_v24  ;;  %v916_v61 = vpop.permute.xlu2 %915  ;;  %v700_v16 = vmul.f32 %v2158_v30, %v648_v35 }
 0x110   : > { %1587 = vpow2.f32 %v1062_v18  ;;  %v733_v28 = vadd.f32 %v701_v0, %v2136_v63  ;;  %v968_v47 = vmul.f32 %v2168_v41, %v916_v61 }
 0x111   : > { %v870_v25 = vadd.f32 %v838_v12, %v736_v49  ;;  %v871_v23 = vadd.f32 %v839_v50, %v737_v36 }
 0x113   : > { %v1004_v29 = vadd.f32 %v972_v1, %v870_v25  ;;  %v1005_v51 = vadd.f32 %v973_v46, %v871_v23  ;;  %v732_v25 = vadd.f32 %v700_v16, %v2134_v62  ;;  %v969_v62 = vmul.f32 %v2170_v55, %v916_v61 }
 0x115   : > { %v2298_v39 = vpop.eup %1585  ;;  %v1056_v52 = vmul.f32 1.442695, %v1004_v29  ;;  %v1058_v54 = vmul.f32 1.442695, %v1005_v51  ;;  %v644_v43 = vpop.permute.xlu0 %643 }
 0x116   : > { %v2300_v17 = vpop.eup %1587  ;;  %v786_v34 = vpop.permute.xlu1 %785  ;;  %1101 = vmatpush.msra.mxu0 %v2298_v39  ;;  %1482 = vmatpush.msra.mxu2 %v2298_v39  ;;  %v699_v63 = vmul.f32 %v2160_v33, %v644_v43 }
 0x117   : > { %1589 = vpow2.f32 %v1056_v52  ;;  %v836_v38 = vmul.f32 %v2175_v56, %v786_v34  ;;  %v837_v10 = vmul.f32 %v2177_v58, %v786_v34  ;;  %1169 = vmatpush.msra.mxu1 %v2300_v17  ;;  %1498 = vmatpush.msra.mxu3 %v2300_v17  ;;  %v912_v20 = vpop.permute.xlu2 %911  ;;  %v698_v52 = vmul.f32 %v2158_v30, %v644_v43 }
 0x118   : > { %1591 = vpow2.f32 %v1058_v54  ;;  %v731_v61 = vadd.f32 %v699_v63, %v2042_v15  ;;  %v967_v0 = vmul.f32 %v2170_v55, %v912_v20 }
 0x119   : > { %v868_v9 = vadd.f32 %v836_v38, %v734_v11  ;;  %v869_v37 = vadd.f32 %v837_v10, %v735_v7 }
 0x11b   : > { %v1002_v18 = vadd.f32 %v970_v19, %v868_v9  ;;  %v1003_v49 = vadd.f32 %v971_v2, %v869_v37  ;;  %v730_v2 = vadd.f32 %v698_v52, %v2040_v14  ;;  %v966_v14 = vmul.f32 %v2168_v41, %v912_v20 }
 0x11d   : > { %v2314_v36 = vpop.eup %1589  ;;  %v1052_v12 = vmul.f32 1.442695, %v1002_v18  ;;  %v1054_v50 = vmul.f32 1.442695, %v1003_v49  ;;  %v640_v1 = vpop.permute.xlu0 %639 }
 0x11e   : > { %v2316_v46 = vpop.eup %1591  ;;  %v782_v23 = vpop.permute.xlu1 %781  ;;  %1102 = vmatpush.msra.mxu0 %v2314_v36  ;;  %1483 = vmatpush.msra.mxu2 %v2314_v36  ;;  %v697_v15 = vmul.f32 %v2160_v33, %v640_v1 }
 0x11f   : > { %1593 = vpow2.f32 %v1052_v12  ;;  %v834_v35 = vmul.f32 %v2175_v56, %v782_v23  ;;  %v835_v45 = vmul.f32 %v2177_v58, %v782_v23  ;;  %1170 = vmatpush.msra.mxu1 %v2316_v46  ;;  %1499 = vmatpush.msra.mxu3 %v2316_v46  ;;  %v908_v9 = vpop.permute.xlu2 %907  ;;  %v696_v12 = vmul.f32 %v2158_v30, %v640_v1 }
 0x120   : > { %1595 = vpow2.f32 %v1054_v50  ;;  %v729_v20 = vadd.f32 %v697_v15, %v2115_v32  ;;  %v965_v63 = vmul.f32 %v2170_v55, %v908_v9 }
 0x121   : > { %v866_v29 = vadd.f32 %v834_v35, %v732_v25  ;;  %v867_v51 = vadd.f32 %v835_v45, %v733_v28 }
 0x123   : > { %v1000_v54 = vadd.f32 %v968_v47, %v866_v29  ;;  %v1001_v11 = vadd.f32 %v969_v62, %v867_v51  ;;  %v728_v62 = vadd.f32 %v696_v12, %v2113_v57  ;;  %v964_v57 = vmul.f32 %v2168_v41, %v908_v9 }
 0x125   : > { %v2330_v34 = vpop.eup %1593  ;;  %v1048_v7 = vmul.f32 1.442695, %v1000_v54  ;;  %v1050_v38 = vmul.f32 1.442695, %v1001_v11  ;;  %v636_v10 = vpop.permute.xlu0 %635 }
 0x126   : > { %v2332_v19 = vpop.eup %1595  ;;  %v778_v37 = vpop.permute.xlu1 %777  ;;  %1103 = vmatpush.msra.mxu0 %v2330_v34  ;;  %1484 = vmatpush.msra.mxu2 %v2330_v34  ;;  %v695_v32 = vmul.f32 %v2160_v33, %v636_v10 }
 0x127   : > { %1597 = vpow2.f32 %v1048_v7  ;;  %v832_v43 = vmul.f32 %v2175_v56, %v778_v37  ;;  %v833_v16 = vmul.f32 %v2177_v58, %v778_v37  ;;  %1171 = vmatpush.msra.mxu1 %v2332_v19  ;;  %1500 = vmatpush.msra.mxu3 %v2332_v19  ;;  %v904_v52 = vpop.permute.xlu2 %903  ;;  %v694_v7 = vmul.f32 %v2158_v30, %v636_v10 }
 0x128   : > { %1599 = vpow2.f32 %v1050_v38  ;;  %v727_v9 = vadd.f32 %v695_v32, %v2111_v27  ;;  %v962_v12 = vmul.f32 %v2168_v41, %v904_v52 }
 0x129   : > { %v864_v18 = vadd.f32 %v832_v43, %v730_v2  ;;  %v865_v49 = vadd.f32 %v833_v16, %v731_v61 }
 0x12b   : > { %v998_v50 = vadd.f32 %v966_v14, %v864_v18  ;;  %v999_v25 = vadd.f32 %v967_v0, %v865_v49  ;;  %v726_v0 = vadd.f32 %v694_v7, %v2109_v31  ;;  %v963_v31 = vmul.f32 %v2170_v55, %v904_v52 }
 0x12d   : > { %v2346_v23 = vpop.eup %1597  ;;  %v1044_v28 = vmul.f32 1.442695, %v998_v50  ;;  %v1046_v35 = vmul.f32 1.442695, %v999_v25  ;;  %v632_v45 = vpop.permute.xlu0 %631 }
 0x12e   : > { %v2348_v47 = vpop.eup %1599  ;;  %v774_v29 = vpop.permute.xlu1 %773  ;;  %1104 = vmatpush.msra.mxu0 %v2346_v23  ;;  %1485 = vmatpush.msra.mxu2 %v2346_v23  ;;  %v692_v25 = vmul.f32 %v2158_v30, %v632_v45  ;;  %v693_v27 = vmul.f32 %v2160_v33, %v632_v45 }
 0x12f   : > { %1601 = vpow2.f32 %v1044_v28  ;;  %v830_v1 = vmul.f32 %v2175_v56, %v774_v29  ;;  %v831_v51 = vmul.f32 %v2177_v58, %v774_v29  ;;  %1172 = vmatpush.msra.mxu1 %v2348_v47  ;;  %1501 = vmatpush.msra.mxu3 %v2348_v47  ;;  %v900_v28 = vpop.permute.xlu2 %899 }
 0x130   : > { %1603 = vpow2.f32 %v1046_v35  ;;  %v725_v52 = vadd.f32 %v693_v27, %v2027_v6  ;;  %v960_v7 = vmul.f32 %v2168_v41, %v900_v28 }
 0x131   : > { %v862_v54 = vadd.f32 %v830_v1, %v728_v62  ;;  %v863_v11 = vadd.f32 %v831_v51, %v729_v20 }
 0x133   : > { %v996_v38 = vadd.f32 %v964_v57, %v862_v54  ;;  %v997_v2 = vadd.f32 %v965_v63, %v863_v11  ;;  %v724_v63 = vadd.f32 %v692_v25, %v2025_v5  ;;  %v961_v5 = vmul.f32 %v2170_v55, %v900_v28 }
 0x135   : > { %v2362_v37 = vpop.eup %1601  ;;  %v1040_v61 = vmul.f32 1.442695, %v996_v38  ;;  %v1042_v43 = vmul.f32 1.442695, %v997_v2  ;;  %v628_v16 = vpop.permute.xlu0 %627 }
 0x136   : > { %v2364_v14 = vpop.eup %1603  ;;  %v770_v18 = vpop.permute.xlu1 %769  ;;  %1105 = vmatpush.msra.mxu0 %v2362_v37  ;;  %1486 = vmatpush.msra.mxu2 %v2362_v37  ;;  %v690_v2 = vmul.f32 %v2158_v30, %v628_v16  ;;  %v691_v6 = vmul.f32 %v2160_v33, %v628_v16 }
 0x137   : > { %1605 = vpow2.f32 %v1040_v61  ;;  %v828_v10 = vmul.f32 %v2175_v56, %v770_v18  ;;  %v829_v49 = vmul.f32 %v2177_v58, %v770_v18  ;;  %1173 = vmatpush.msra.mxu1 %v2364_v14  ;;  %1502 = vmatpush.msra.mxu3 %v2364_v14 }
 0x138   : > { %1607 = vpow2.f32 %v1042_v43 }
 0x139   : > { %v860_v15 = vadd.f32 %v828_v10, %v726_v0  ;;  %v861_v50 = vadd.f32 %v829_v49, %v727_v9  ;;  %v896_v0 = vpop.permute.xlu2 %895 }
 0x13a   : > { %v958_v28 = vmul.f32 %v2168_v41, %v896_v0 }
 0x13b   : > { %v994_v35 = vadd.f32 %v962_v12, %v860_v15  ;;  %v995_v62 = vadd.f32 %v963_v31, %v861_v50  ;;  %v722_v31 = vadd.f32 %v690_v2, %v2088_v4  ;;  %v723_v50 = vadd.f32 %v691_v6, %v2090_v44 }
 0x13c   : > { %v959_v4 = vmul.f32 %v2170_v55, %v896_v0 }
 0x13d   : > { %v2378_v29 = vpop.eup %1605  ;;  %v1036_v20 = vmul.f32 1.442695, %v994_v35  ;;  %v1038_v1 = vmul.f32 1.442695, %v995_v62  ;;  %v624_v51 = vpop.permute.xlu0 %623 }
 0x13e   : > { %v2380_v57 = vpop.eup %1607  ;;  %v766_v54 = vpop.permute.xlu1 %765  ;;  %1106 = vmatpush.msra.mxu0 %v2378_v29  ;;  %1487 = vmatpush.msra.mxu2 %v2378_v29  ;;  %v688_v62 = vmul.f32 %v2158_v30, %v624_v51  ;;  %v689_v44 = vmul.f32 %v2160_v33, %v624_v51 }
 0x13f   : > { %1609 = vpow2.f32 %v1036_v20  ;;  %v826_v45 = vmul.f32 %v2175_v56, %v766_v54  ;;  %v827_v11 = vmul.f32 %v2177_v58, %v766_v54  ;;  %1174 = vmatpush.msra.mxu1 %v2380_v57  ;;  %1503 = vmatpush.msra.mxu3 %v2380_v57 }
 0x140   : > { %1611 = vpow2.f32 %v1038_v1 }
 0x141   : > { %v858_v32 = vadd.f32 %v826_v45, %v724_v63  ;;  %v859_v38 = vadd.f32 %v827_v11, %v725_v52 }
 0x143   : > { %v992_v61 = vadd.f32 %v960_v7, %v858_v32  ;;  %v993_v43 = vadd.f32 %v961_v5, %v859_v38  ;;  %v720_v7 = vadd.f32 %v688_v62, %v2084_v40  ;;  %v892_v5 = vpop.permute.xlu2 %891  ;;  %v721_v38 = vadd.f32 %v689_v44, %v2086_v3 }
 0x144   : > { %v956_v40 = vmul.f32 %v2168_v41, %v892_v5  ;;  %v957_v6 = vmul.f32 %v2170_v55, %v892_v5 }
 0x145   : > { %v2394_v18 = vpop.eup %1609  ;;  %v1032_v9 = vmul.f32 1.442695, %v992_v61  ;;  %v1034_v10 = vmul.f32 1.442695, %v993_v43  ;;  %v620_v49 = vpop.permute.xlu0 %619 }
 0x146   : > { %v2396_v12 = vpop.eup %1611  ;;  %v762_v15 = vpop.permute.xlu1 %761  ;;  %1107 = vmatpush.msra.mxu0 %v2394_v18  ;;  %1488 = vmatpush.msra.mxu2 %v2394_v18  ;;  %v687_v62 = vmul.f32 %v2160_v33, %v620_v49 }
 0x147   : > { %1613 = vpow2.f32 %v1032_v9  ;;  %v824_v16 = vmul.f32 %v2175_v56, %v762_v15  ;;  %v825_v25 = vmul.f32 %v2177_v58, %v762_v15  ;;  %1175 = vmatpush.msra.mxu1 %v2396_v12  ;;  %1504 = vmatpush.msra.mxu3 %v2396_v12 }
 0x148   : > { %1615 = vpow2.f32 %v1034_v10 }
 0x149   : > { %v856_v27 = vadd.f32 %v824_v16, %v722_v31  ;;  %v857_v35 = vadd.f32 %v825_v25, %v723_v50 }
 0x14b   : > { %v990_v20 = vadd.f32 %v958_v28, %v856_v27  ;;  %v991_v1 = vadd.f32 %v959_v4, %v857_v35  ;;  %v686_v27 = vmul.f32 %v2158_v30, %v620_v49 }
 0x14d   : > { %v2410_v63 = vpop.eup %1613  ;;  %v1028_v54 = vmul.f32 1.442695, %v990_v20  ;;  %v1030_v52 = vmul.f32 1.442695, %v991_v1  ;;  %v616_v45 = vpop.permute.xlu0 %615  ;;  %v718_v5 = vadd.f32 %v686_v27, %v2012_v60  ;;  %v1090_v27 = vld [vmem:[%s2623_s4 + $0x50] sm:$0xff] }
 0x14e   : > { %v2412_v11 = vpop.eup %1615  ;;  %v758_v32 = vpop.permute.xlu1 %757  ;;  %1108 = vmatpush.msra.mxu0 %v2410_v63  ;;  %1489 = vmatpush.msra.mxu2 %v2410_v63  ;;  %v684_v50 = vmul.f32 %v2158_v30, %v616_v45  ;;  %v685_v28 = vmul.f32 %v2160_v33, %v616_v45 }
 0x14f   : > { %1617 = vpow2.f32 %v1028_v54  ;;  %v822_v51 = vmul.f32 %v2175_v56, %v758_v32  ;;  %v823_v2 = vmul.f32 %v2177_v58, %v758_v32  ;;  %1176 = vmatpush.msra.mxu1 %v2412_v11  ;;  %1505 = vmatpush.msra.mxu3 %v2412_v11  ;;  %v884_v20 = vpop.permute.xlu2 %883 }
 0x150   : > { %1619 = vpow2.f32 %v1030_v52  ;;  %v716_v44 = vadd.f32 %v684_v50, %v2063_v48  ;;  %v717_v1 = vadd.f32 %v685_v28, %v2065_v53  ;;  %v952_v33 = vmul.f32 %v2168_v41, %v884_v20  ;;  %v1089_v28 = vld [vmem:[%s2623_s4 + $0x48] sm:$0xff] }
 0x151   : > { %v854_v61 = vadd.f32 %v822_v51, %v720_v7  ;;  %v855_v43 = vadd.f32 %v823_v2, %v721_v38  ;;  %v2635_v38 = vld [vmem:[#allocation9_spill] sm:$0xff]  ;;  %v953_v48 = vmul.f32 %v2170_v55, %v884_v20 }
 0x152   : > { %v719_v51 = vadd.f32 %v687_v62, %v2635_v38  ;;  %v1091_v62 = vld [vmem:[%s2623_s4 + $0x58] sm:$0xff]  ;;  %v1092_v20 = vld [vmem:[%s2623_s4 + $0x60] sm:$0xff] }
 0x153   : > { %v988_v0 = vadd.f32 %v956_v40, %v854_v61  ;;  %v989_v9 = vadd.f32 %v957_v6, %v855_v43  ;;  %v1087_v38 = vld [vmem:[%s2623_s4 + $0x38] sm:$0xff] }
 0x155   : > { %v2424_v10 = vpop.eup %1617  ;;  %v1024_v3 = vmul.f32 1.442695, %v988_v0  ;;  %v1026_v31 = vmul.f32 1.442695, %v989_v9 }
 0x156   : > { %v2426_v15 = vpop.eup %1619  ;;  %v754_v16 = vpop.permute.xlu1 %753  ;;  %1109 = vmatpush.msra.mxu0 %v2424_v10  ;;  %1490 = vmatpush.msra.mxu2 %v2424_v10 }
 0x157   : > { %v750_v25 = vpop.permute.xlu0 %749  ;;  %1621 = vpow2.f32 %v1024_v3  ;;  %1177 = vmatpush.msra.mxu1 %v2426_v15  ;;  %1506 = vmatpush.msra.mxu3 %v2426_v15  ;;  %v820_v54 = vmul.f32 %v2175_v56, %v754_v16  ;;  %v821_v52 = vmul.f32 %v2177_v58, %v754_v16  ;;  %v1088_v16 = vld [vmem:[%s2623_s4 + $0x40] sm:$0xff] }
 0x158   : > { %1623 = vpow2.f32 %v1026_v31  ;;  %v818_v4 = vmul.f32 %v2175_v56, %v750_v25  ;;  %v819_v35 = vmul.f32 %v2177_v58, %v750_v25 }
 0x159   : > { %v852_v53 = vadd.f32 %v820_v54, %v718_v5  ;;  %v853_v60 = vadd.f32 %v821_v52, %v719_v51  ;;  %v1093_v54 = vld [vmem:[%s2623_s4 + $0x68] sm:$0xff]  ;;  %v1086_v5 = vld [vmem:[%s2623_s4 + $0x30] sm:$0xff]  ;;  %v1096_v51 = vld [vmem:[%s2623_s4 + $0x80] sm:$0xff] }
 0x15a   : > { %v850_v45 = vadd.f32 %v818_v4, %v716_v44  ;;  %v851_v32 = vadd.f32 %v819_v35, %v717_v1  ;;  %v1081_v4 = vld [vmem:[%s2623_s4 + $0x8] sm:$0xff]  ;;  %v1082_v35 = vld [vmem:[%s2623_s4 + $0x10] sm:$0xff]  ;;  %v1083_v44 = vld [vmem:[%s2623_s4 + $0x18] sm:$0xff] }
 0x15b   : > { %v1084_v1 = vld [vmem:[%s2623_s4 + $0x20] sm:$0xff]  ;;  %v1085_v52 = vld [vmem:[%s2623_s4 + $0x28] sm:$0xff] }
 0x15c   : > { %v984_v58 = vadd.f32 %v952_v33, %v850_v45  ;;  %v985_v40 = vadd.f32 %v953_v48, %v851_v32  ;;  %v1094_v45 = vld [vmem:[%s2623_s4 + $0x70] sm:$0xff]  ;;  %v1095_v32 = vld [vmem:[%s2623_s4 + $0x78] sm:$0xff] }
 0x15d   : > { %v2442_v7 = vpop.eup %1621 }
 0x15e   : > { %v2445_v30 = vpop.eup %1623  ;;  %1110 = vmatpush.msra.mxu0 %v2442_v7  ;;  %1491 = vmatpush.msra.mxu2 %v2442_v7  ;;  %v1016_v43 = vmul.f32 1.442695, %v984_v58  ;;  %v1018_v3 = vmul.f32 1.442695, %v985_v40 }
 0x15f   : > { %1178 = vmatpush.msra.mxu1 %v2445_v30  ;;  %1507 = vmatpush.msra.mxu3 %v2445_v30  ;;  %v888_v56 = vpop.permute.xlu1 %887 }
 0x160   : > { %v954_v49 = vmul.f32 %v2168_v41, %v888_v56  ;;  %v955_v2 = vmul.f32 %v2170_v55, %v888_v56  ;;  %v1080_v55 = vld [vmem:[%s2623_s4] sm:$0xff] }
 0x162   : > { %v986_v6 = vadd.f32 %v954_v49, %v852_v53  ;;  %v987_v61 = vadd.f32 %v955_v2, %v853_v60 }
 0x164   : > { %v1020_v0 = vmul.f32 1.442695, %v986_v6  ;;  %v1022_v9 = vmul.f32 1.442695, %v987_v61 }
 0x166   : > { %1625 = vpow2.f32 %v1020_v0 }
 0x167   : > { %1627 = vpow2.f32 %v1022_v9 }
 0x168   : > { %1629 = vpow2.f32 %v1016_v43 }
 0x169   : > { %1631 = vpow2.f32 %v1018_v3 }
 0x16c   : > { %v2456_v31 = vpop.eup %1625 }
 0x16d   : > { %v2458_v50 = vpop.eup %1627  ;;  %1111 = vmatpush.msra.mxu0 %v2456_v31  ;;  %1492 = vmatpush.msra.mxu2 %v2456_v31 }
 0x16e   : > { %v2462_v41 = vpop.eup %1629  ;;  %1179 = vmatpush.msra.mxu1 %v2458_v50  ;;  %1508 = vmatpush.msra.mxu3 %v2458_v50 }
 0x16f   : > { %v2472_v25 = vpop.eup %1631  ;;  %1112 = vmatpush.msra.mxu0 %v2462_v41  ;;  %1493 = vmatpush.msra.mxu2 %v2462_v41 }
 0x170   : > { %1180 = vmatpush.msra.mxu1 %v2472_v25  ;;  %1509 = vmatpush.msra.mxu3 %v2472_v25 }
 0x171   : > { %1113 = vmatmul.f32.vlgmr.msra.gmra.mxu0 %v1080_v55  ;;  %1137 = vmatmul.f32.vlgmr.msra.gmra.mxu2 %v1088_v16 }
 0x172   : > { %1181 = vmatmul.f32.vlgmr.msra.gmra.mxu1 %v1080_v55  ;;  %1208 = vmatmul.f32.vlgmr.msra.gmra.mxu3 %v1089_v28 }
 0x179   : > { %1116 = vmatmul.f32.gmra.mxu0 %v1081_v4  ;;  %1140 = vmatmul.f32.gmra.mxu2 %v1089_v28 }
 0x17a   : > { %1184 = vmatmul.f32.gmra.mxu1 %v1081_v4  ;;  %1211 = vmatmul.f32.gmra.mxu3 %v1090_v27 }
 0x181   : > { %1119 = vmatmul.f32.gmra.mxu0 %v1082_v35  ;;  %1143 = vmatmul.f32.gmra.mxu2 %v1090_v27 }
 0x182   : > { %1187 = vmatmul.f32.gmra.mxu1 %v1082_v35  ;;  %1214 = vmatmul.f32.gmra.mxu3 %v1091_v62 }
 0x189   : > { %1122 = vmatmul.f32.gmra.mxu0 %v1083_v44  ;;  %1146 = vmatmul.f32.gmra.mxu2 %v1091_v62 }
 0x18a   : > { %1190 = vmatmul.f32.gmra.mxu1 %v1083_v44  ;;  %1217 = vmatmul.f32.gmra.mxu3 %v1092_v20 }
 0x191   : > { %1125 = vmatmul.f32.gmra.mxu0 %v1084_v1  ;;  %1149 = vmatmul.f32.gmra.mxu2 %v1092_v20 }
 0x192   : > { %1193 = vmatmul.f32.gmra.mxu1 %v1084_v1  ;;  %1220 = vmatmul.f32.gmra.mxu3 %v1093_v54 }
 0x199   : > { %1128 = vmatmul.f32.gmra.mxu0 %v1085_v52  ;;  %1152 = vmatmul.f32.gmra.mxu2 %v1093_v54 }
 0x19a   : > { %1196 = vmatmul.f32.gmra.mxu1 %v1085_v52  ;;  %1223 = vmatmul.f32.gmra.mxu3 %v1094_v45 }
 0x1a1   : > { %1131 = vmatmul.f32.gmra.mxu0 %v1086_v5  ;;  %1155 = vmatmul.f32.gmra.mxu2 %v1094_v45 }
 0x1a2   : > { %1199 = vmatmul.f32.gmra.mxu1 %v1086_v5  ;;  %1226 = vmatmul.f32.gmra.mxu3 %v1095_v32 }
 0x1a9   : > { %1134 = vmatmul.f32.gmra.mxu0 %v1087_v38  ;;  %1158 = vmatmul.f32.gmra.mxu2 %v1095_v32 }
 0x1aa   : > { %1202 = vmatmul.f32.gmra.mxu1 %v1087_v38  ;;  %1229 = vmatmul.f32.gmra.mxu3 %v1096_v51 }
 0x1b1   : > { %1161 = vmatmul.f32.gmra.mxu2 %v1096_v51 }
 0x1b2   : > { %1205 = vmatmul.f32.gmra.mxu1 %v1088_v16 }
 0x1ee   : > { %v1114_v33 = vpop.f32.mrf.mxu0 }
 0x1ef   : > { %1233 = vst [vmem:[%s291_s25] sm:$0xff] %v1114_v33  ;;  %v1182_v48 = vpop.f32.mrf.mxu1 }
 0x1f0   : > { %1234 = vst [vmem:[%s291_s25 + $0x8] sm:$0xff] %v1182_v48 }
 0x1f1   : > { %1660 = shalt.err (!%p1657_p3)
}
 0x1f2   : > { %1510 = dma.vmem_to_hbm [thread:$0]  (%p1814_p5), %s1344_s30, 256, %s1346_s9, %s1325_s10   ;;  %vm1316_vm0 = vcmask 1040384  }
 0x1f3   : > { %s1235_s22 = sld [smem:[#allocation2]]  ;;  %s1466_s23 = sshll.u32 %s2524_s19, 1 }
 0x1f4   : > { %v1138_v53 = vpop.f32.mrf.mxu2  ;;  %s1355_s30 = scalar_lea.hbm %s2626_s7, %s1965_s18  ;;  %s298_s9 = scalar_lea.vmem [#allocation5], %s1466_s23 }
 0x1f5   : > { %v2542_v60 = vpop.f32.mrf.mxu3  ;;  %s1357_s10 = sshll.u32 %s298_s9, 4  ;;  %s1359_s14 = sshll.u32 %s1355_s30, 4  ;;  %s1358_s10 = int_to_ptr.vmem [resolvable:$true] %s1357_s10  ;;  %s1360_s14 = int_to_ptr.hbm [resolvable:$true] %s1359_s14 }
 0x1f6   : > { %v1117_v56 = vpop.f32.mrf.mxu0  ;;  %s1330_s15 = scalar_lea.sflag [#allocation6], %s2524_s19  ;;  %s1675_s18 = sshra.s32 %s1360_s14, 4  ;;  %s1676_s18 = int_to_ptr.hbm [resolvable:$true] %s1675_s18 }
 0x1f7   : > { %v1185_v58 = vpop.f32.mrf.mxu1  ;;  %v1236_v20 = vmul.f32 %v2462_v41, %v1117_v56  ;;  %s1677_s5 = scalar_lea.hbm %s1676_s18, 2  ;;  %s1681_s20 = scalar_lea.hbm %s2626_s7, 4 }
 0x1f8   : > { %p1678_p4 = scmp.ne.s32.totalorder %s1676_s18, %s1677_s5  ;;  %p1682_p9 = scmp.lt.s32.totalorder %s1676_s18, %s2626_s7 }
 0x1f9   : > { %p1683_p10 = scmp.lt.s32.totalorder %s1681_s20, %s1677_s5 }
 0x1fa   : > { %p1679_p7 = pnand %p1678_p4, %p1814_p5 }
 0x1fb   : > { %p1684_p11 = por %p1683_p10, %p1682_p9 }
 0x1fc   : > { %v1141_v49 = vpop.f32.mrf.mxu2  ;;  %p1680_p8 = pneg %p1679_p7 }
 0x1fd   : > { %v2544_v6 = vpop.f32.mrf.mxu3 }
 0x1fe   : > { %v1120_v2 = vpop.f32.mrf.mxu0  ;;  %p1685_p12 = pnand %p1684_p11, %p1680_p8 }
 0x1ff   : > { %v1188_v40 = vpop.f32.mrf.mxu1  ;;  %v1238_v62 = vmul.f32 %v2456_v31, %v1120_v2  ;;  %v1237_v31 = vmul.f32 %v2472_v25, %v1185_v58  ;;  %v1252_v58 = vmul.f32 %v2346_v23, %v1141_v49  ;;  %v1253_v23 = vmul.f32 %v2348_v47, %v2542_v60 }
 0x200   : > { %v1239_v33 = vmul.f32 %v2458_v50, %v1188_v40  ;;  %v1250_v40 = vmul.f32 %v2362_v37, %v1138_v53 }
 0x201   : > { %v1268_v52 = vadd.f32 %v1238_v62, %v1236_v20 }
 0x202   : > { %v1289_v2 = vadd.f32 %v1239_v33, %v1237_v31 }
 0x204   : > { %v1144_v61 = vpop.f32.mrf.mxu2 }
 0x205   : > { %v2546_v9 = vpop.f32.mrf.mxu3 }
 0x206   : > { %v1123_v43 = vpop.f32.mrf.mxu0 }
 0x207   : > { %v1191_v0 = vpop.f32.mrf.mxu1  ;;  %v1240_v1 = vmul.f32 %v2442_v7, %v1123_v43 }
 0x208   : > { %v1241_v41 = vmul.f32 %v2445_v30, %v1191_v0 }
 0x209   : > { %v1269_v38 = vadd.f32 %v1268_v52, %v1240_v1 }
 0x20c   : > { %v1147_v3 = vpop.f32.mrf.mxu2 }
 0x20d   : > { %v2548_v4 = vpop.f32.mrf.mxu3 }
 0x20e   : > { %v1126_v55 = vpop.f32.mrf.mxu0 }
 0x20f   : > { %v1194_v16 = vpop.f32.mrf.mxu1  ;;  %v1242_v45 = vmul.f32 %v2424_v10, %v1126_v55 }
 0x210   : > { %v1243_v43 = vmul.f32 %v2426_v15, %v1194_v16 }
 0x211   : > { %v1270_v48 = vadd.f32 %v1269_v38, %v1242_v45 }
 0x214   : > { %v1150_v28 = vpop.f32.mrf.mxu2 }
 0x215   : > { %v1221_v5 = vpop.f32.mrf.mxu3 }
 0x216   : > { %v1129_v27 = vpop.f32.mrf.mxu0 }
 0x217   : > { %v1197_v35 = vpop.f32.mrf.mxu1  ;;  %v1244_v51 = vmul.f32 %v2410_v63, %v1129_v27  ;;  %v1290_v63 = vadd.f32 %v1289_v2, %v1241_v41 }
 0x218   : > { %v1245_v50 = vmul.f32 %v2412_v11, %v1197_v35  ;;  %v1256_v11 = vmul.f32 %v2314_v36, %v1147_v3 }
 0x219   : > { %v1271_v7 = vadd.f32 %v1270_v48, %v1244_v51  ;;  %v1291_v25 = vadd.f32 %v1290_v63, %v1243_v43  ;;  %v1319_v63 = vlaneseq }
 0x21b   : > { %v1292_v1 = vadd.f32 %v1291_v25, %v1245_v50  ;;  %v1310_v50 = vstv %s1235_s22  ;;  %vm1321_vm1 = vcmp.lt.s32.totalorder %v1319_v63, 256 }
 0x21c   : > { %v1153_v44 = vpop.f32.mrf.mxu2 }
 0x21e   : > { %v1132_v54 = vpop.f32.mrf.mxu0 }
 0x21f   : > { %v1200_v32 = vpop.f32.mrf.mxu1  ;;  %v1246_v13 = vmul.f32 %v2394_v18, %v1132_v54  ;;  %v1224_v18 = vpop.f32.mrf.mxu3 }
 0x220   : > { %v1247_v30 = vmul.f32 %v2396_v12, %v1200_v32  ;;  %v1258_v12 = vmul.f32 %v2298_v39, %v1150_v28  ;;  %v1263_v48 = vmul.f32 %v2268_v26, %v1224_v18 }
 0x221   : > { %v1272_v55 = vadd.f32 %v1271_v7, %v1246_v13 }
 0x222   : > { %v1293_v54 = vadd.f32 %v1292_v1, %v1247_v30 }
 0x224   : > { %v1156_v56 = vpop.f32.mrf.mxu2 }
 0x225   : > { %v1262_v3 = vmul.f32 %v2266_v21, %v1156_v56 }
 0x226   : > { %v1135_v10 = vpop.f32.mrf.mxu0 }
 0x227   : > { %v1248_v62 = vmul.f32 %v2378_v29, %v1135_v10  ;;  %v1203_v20 = vpop.f32.mrf.mxu1  ;;  %v1254_v29 = vmul.f32 %v2330_v34, %v1144_v61  ;;  %v1227_v32 = vpop.f32.mrf.mxu3  ;;  %v1255_v61 = vmul.f32 %v2332_v19, %v2544_v6  ;;  %v1261_v19 = vmul.f32 %v2284_v24, %v1221_v5 }
 0x228   : > { %v1249_v15 = vmul.f32 %v2380_v57, %v1203_v20  ;;  %v1260_v57 = vmul.f32 %v2282_v22, %v1153_v44  ;;  %v1259_v22 = vmul.f32 %v2300_v17, %v2548_v4  ;;  %v2636_v17 = vld [vmem:[#allocation10_spill] sm:$0xff] }
 0x229   : > { %v1273_v27 = vadd.f32 %v1272_v55, %v1248_v62 }
 0x22a   : > { %v1294_v53 = vadd.f32 %v1293_v54, %v1249_v15 }
 0x22b   : > { %v1274_v0 = vadd.f32 %v1273_v27, %v1250_v40 }
 0x22c   : > { %v1159_v13 = vpop.f32.mrf.mxu2 }
 0x22d   : > { %v1275_v16 = vadd.f32 %v1274_v0, %v1252_v58  ;;  %v1264_v51 = vmul.f32 %v2242_v42, %v1159_v13  ;;  %v1265_v42 = vmul.f32 %v2244_v8, %v1227_v32 }
 0x22f   : > { %v1276_v35 = vadd.f32 %v1275_v16, %v1254_v29  ;;  %v1206_v37 = vpop.f32.mrf.mxu1 }
 0x230   : > { %v1251_v52 = vmul.f32 %v2364_v14, %v1206_v37  ;;  %v1257_v14 = vmul.f32 %v2316_v46, %v2546_v9  ;;  %v1230_v46 = vpop.f32.mrf.mxu3 }
 0x231   : > { %v1277_v45 = vadd.f32 %v1276_v35, %v1256_v11  ;;  %v1267_v4 = vmul.f32 %v2636_v17, %v1230_v46 }
 0x232   : > { %v1295_v49 = vadd.f32 %v1294_v53, %v1251_v52 }
 0x233   : > { %v1278_v34 = vadd.f32 %v1277_v45, %v1258_v12 }
 0x234   : > { %v1296_v36 = vadd.f32 %v1295_v49, %v1253_v23  ;;  %v1162_v28 = vpop.f32.mrf.mxu2 }
 0x235   : > { %v1279_v38 = vadd.f32 %v1278_v34, %v1260_v57  ;;  %v1266_v33 = vmul.f32 %v2218_v59, %v1162_v28 }
 0x236   : > { %v1297_v39 = vadd.f32 %v1296_v36, %v1255_v61 }
 0x237   : > { %v1280_v47 = vadd.f32 %v1279_v38, %v1262_v3 }
 0x238   : > { %v1298_v60 = vadd.f32 %v1297_v39, %v1257_v14 }
 0x239   : > { %v1281_v44 = vadd.f32 %v1280_v47, %v1264_v51 }
 0x23a   : > { %v1299_v6 = vadd.f32 %v1298_v60, %v1259_v22 }
 0x23b   : > { %v1282_v21 = vadd.f32 %v1281_v44, %v1266_v33 }
 0x23c   : > { %v1300_v31 = vadd.f32 %v1299_v6, %v1261_v19 }
 0x23d   : > { %v1283_v9 = vrot.slane %v1282_v21, 4 }
 0x23e   : > { %v1301_v41 = vadd.f32 %v1300_v31, %v1263_v48 }
 0x23f   : > { %v1284_v56 = vadd.f32 %v1283_v9, %v1282_v21 }
 0x240   : > { %v1302_v7 = vadd.f32 %v1301_v41, %v1265_v42 }
 0x241   : > { %v1285_v59 = vrot.slane %v1284_v56, 2 }
 0x242   : > { %v1303_v2 = vadd.f32 %v1302_v7, %v1267_v4 }
 0x243   : > { %v1286_v24 = vadd.f32 %v1285_v59, %v1284_v56 }
 0x244   : > { %v1304_v43 = vrot.slane %v1303_v2, 4 }
 0x245   : > { %v1287_v26 = vrot.slane %v1286_v24, 1 }
 0x246   : > { %v1305_v5 = vadd.f32 %v1304_v43, %v1303_v2 }
 0x247   : > { %v1288_v8 = vadd.f32 %v1287_v26, %v1286_v24 }
 0x248   : > { %v1306_v10 = vrot.slane %v1305_v5, 2 }
 0x249   : > { %v1311_v18 = vsub.f32 %v1310_v50, %v1288_v8 }
 0x24a   : > { %v1307_v55 = vadd.f32 %v1306_v10, %v1305_v5 }
 0x24c   : > { %v1308_v62 = vrot.slane %v1307_v55, 1 }
 0x24e   : > { %v1309_v20 = vadd.f32 %v1308_v62, %v1307_v55 }
 0x250   : > { %v1312_v40 = vsub.f32 %v1310_v50, %v1309_v20 }
 0x252   : > { %v1315_v27 = vrot.slane %v1312_v40, 7 }
 0x254   : > { %v1317_v25 = vsel %vm1316_vm0, %v1311_v18, %v1315_v27 }
 0x255   : > { %1323 = vst.msk [vmem:[%s298_s9] sm:$0x3] %vm1321_vm1, %v1317_v25 }
 0x256   : > { %1688 = shalt.err (!%p1685_p12)
}
 0x257   : > { %1511 = dma.vmem_to_hbm [thread:$0]  (%p1814_p5), %s1358_s10, 32, %s1360_s14, %s1330_s15  }
 0x258 PF: > { %p1521_p13 = scmp.ge.s32.totalorder %s1727_s29, 2  ;;  %s1371_s19 = sand.u32 1, %s1715_s26  }
 0x259   : > { %s1372_s23 = scalar_lea.sflag [#allocation4], %s1371_s19 }
 0x25a   : > { %p1515_p0 = pnand %p1521_p13, %p1818_p6 }
 0x25c   : > { %p1516_p1 = pneg %p1515_p0 }
 0x25e   : > { %1706 = dma.done.wait (%p1516_p1), %s1372_s23, 256  }
 0x25f   : > { %1708 = vsyncadd (%p1516_p1), %s1372_s23, 4294967040  ;;  %s1382_s24 = scalar_lea.sflag [#allocation6], %s1371_s19 }
 0x260   : > { %1710 = dma.done.wait (%p1516_p1), %s1382_s24, 32  }
 0x261   : > { %1712 = vsyncadd (%p1516_p1), %s1382_s24, 4294967264  ;;  %p22_p5 = scmp.ge.s32.totalorder %s1801_s8, 4   ;;  %s2637_s26 = smov %s1719_s27 }
 0x262   : > { %s2638_s27 = smov %s1723_s28  ;;  %s2639_s28 = smov %s1812_s11 }
 0x263   : > { %s2640_s29 = smov %s1801_s8  ;;  %24 = sbr.rel (!%p22_p5) target bundleno = 7 (0x7), region = 99 }
 0x268   :  { %1388 = vsyncpa [#allocation4], 1 }
 0x269   :  { %1390 = vsyncpa [#allocation4 + $0x1], 1 }
 0x26a   :  { %1391 = vsyncpa [#allocation6], 1 }
 0x26b   :  { %1393 = vsyncpa [#allocation6 + $0x1], 1 }

</bundles_post_ra>
